<compile_context>
chip_gen: v5e
topology: v5e:2x2
jax: 0.10.0
libtpu: 0.0.40
codegen_flags: <defaults>
</compile_context>

<pallas_src>
import functools

import jax
import jax.numpy as jnp
from jax.experimental import pallas as pl
from jax.experimental.pallas import tpu as pltpu

LANE = 128


def _round_up(x, m):
    return (x + m - 1) // m * m


def _gcn_fused_kernel(feat_ref, adj_ref, w_ref, b_ref, h_ref, g_ref, *,
                      alphas, num_layers, tb, n, fp):
    """Fused L-layer GCN for a tile of TB graphs (intermediates never leave VMEM).

    feat_ref: (TB, N, FP) bf16    adj_ref: (TB, N, N) f32 (cast per layer)
    w_ref:    (L, FP, FP) bf16    b_ref:   (L, 1, FP) f32
    h_ref:    (TB, N, FP) bf16    g_ref:   (TB, L, FP) f32
    """
    x = feat_ref[...]                               # consumed by layer 0 only
    # TODO(synk): switch to lax.fori_loop with dynamic w_ref[l]/b_ref[l] indexing
    # if num_layers grows beyond ~4-6 (static unroll inflates vreg live ranges).
    for l in range(num_layers):                     # static unroll (L is small)
        w = w_ref[l]                                # (FP, FP) bf16
        b = b_ref[l]                                # (1, FP)  f32

        # Linear: flatten (TB, N) -> M so the MXU M dimension is filled.
        xw = jnp.dot(x.reshape(tb * n, fp), w,
                     preferred_element_type=jnp.float32)
        xw = xw.reshape(tb, n, fp).astype(jnp.bfloat16)

        # Graph propagation: per-graph adj @ (x W), f32 accumulation on the MXU.
        # adj is re-read from its resident VMEM block and cast per layer so no
        # adj-sized value stays live across the whole unrolled loop.
        out = jnp.einsum('bnm,bmo->bno',
                         adj_ref[...].astype(jnp.bfloat16), xw,
                         preferred_element_type=jnp.float32)
        out = out + b                               # bias broadcast (f32)
        h = jnp.where(out > 0, out, jnp.float32(alphas[l]) * out)   # PReLU

        # Per-layer graph readout, lane-dense (last dim FP = 128-aligned).
        g_ref[:, l:l + 1, :] = jnp.sum(h, axis=1, keepdims=True)

        x = h.astype(jnp.bfloat16)                  # next layer's input stays on-chip

    h_ref[...] = x                                  # only the final h hits HBM (bf16)


class GCNPallas:
    """Pallas-TPU forward matching the PyTorch GCN(in_ft, out_ft, num_layers)."""

    def __init__(self, in_ft, out_ft, num_layers, key):
        self.in_ft = in_ft
        self.out_ft = out_ft
        self.num_layers = num_layers

        # Raw (unpadded, f32) parameters, mirroring the torch init.
        self.params = []
        dims = [in_ft] + [out_ft] * num_layers
        for i in range(num_layers):
            key, wk = jax.random.split(key)
            fin, fout = dims[i], dims[i + 1]
            limit = jnp.sqrt(6.0 / (fin + fout))         # xavier_uniform_
            w = jax.random.uniform(wk, (fin, fout), jnp.float32, -limit, limit)
            b = jnp.zeros((fout,), jnp.float32)          # bias.data.fill_(0.0)
            alpha = 0.25                                 # nn.PReLU() default init
            self.params.append((w, b, alpha))

        # Padded / stacked / bf16 parameters used by the fused kernel.
        self.fp = _round_up(max(in_ft, out_ft), LANE)
        w_stack = jnp.zeros((num_layers, self.fp, self.fp), jnp.float32)
        b_stack = jnp.zeros((num_layers, 1, self.fp), jnp.float32)
        for l, (w, b, _) in enumerate(self.params):
            fin, fout = w.shape
            w_stack = w_stack.at[l, :fin, :fout].set(w)
            b_stack = b_stack.at[l, 0, :fout].set(b)
        self.w_stack = w_stack.astype(jnp.bfloat16)
        self.b_stack = b_stack
        # TODO(synk): alpha is a learned nn.PReLU parameter in torch; here it is a
        # compile-time constant per layer (any alpha update forces a recompile).
        self.alphas = tuple(float(a) for (_, _, a) in self.params)

        # Generation-aware VMEM budget (v7x has 64 MiB/TC, v5e/v6e have 128 MiB).
        try:
            vmem_phys = int(pltpu.get_tpu_info().vmem_capacity_bytes)
        except Exception:
            vmem_phys = 64 * 1024 * 1024                 # conservative fallback
        if vmem_phys <= 64 * 1024 * 1024:                # v7x-class
            self.vmem_limit = 40 * 1024 * 1024
            self.vmem_budget = 34 * 1024 * 1024
        else:                                            # v5e / v6e
            self.vmem_limit = 100 * 1024 * 1024
            self.vmem_budget = 88 * 1024 * 1024

    def _choose_tb(self, B, N):
        """Graphs per grid step: largest divisor of B under the VMEM budget,
        capped so the grid keeps >=2 steps (megacore sharding / pipelining)."""
        L, FP = self.num_layers, self.fp

        def vmem_bytes(tb):
            adj_in = 2 * tb * N * N * 4          # f32 adj input, double-buffered
            feat_in = 2 * tb * N * FP * 2        # bf16 feat input
            h_out = 2 * tb * N * FP * 2          # bf16 h output
            g_out = 2 * tb * L * FP * 4          # f32 readouts
            w_in = 2 * L * FP * FP * 2           # bf16 weights (double-buffered)
            b_in = 2 * L * FP * 4
            temps = tb * N * N * 2 + 4 * tb * N * FP * 4   # adj cast + xw/out/h temps
            return adj_in + feat_in + h_out + g_out + w_in + b_in + temps

        tb_cap = max(1, B // 2)
        best = 1
        for tb in range(1, B + 1):
            if B % tb or tb > tb_cap:
                continue
            if vmem_bytes(tb) <= self.vmem_budget:
                best = max(best, tb)
        # TODO(synk): if even tb=1 exceeds the budget (very large N), tile over N.
        return best

    @functools.partial(jax.jit, static_argnums=0)
    def __call__(self, feat, adj):
        B, N, F_in = feat.shape
        assert F_in == self.in_ft and adj.shape == (B, N, N)
        L, FP = self.num_layers, self.fp

        tb = self._choose_tb(B, N)
        grid = B // tb

        # Pad only the feature dim (needed to match the FP-wide stacked weights).
        # adj is passed raw (f32, unpadded) -> no second HBM copy of it.
        if F_in != FP:
            feat_in = jnp.pad(feat, ((0, 0), (0, 0), (0, FP - F_in)))
        else:
            feat_in = feat
        feat_in = feat_in.astype(jnp.bfloat16)
        adj_in = adj.astype(jnp.float32)             # no-op when already f32

        kernel = functools.partial(
            _gcn_fused_kernel, alphas=self.alphas, num_layers=L,
            tb=tb, n=N, fp=FP)

        flops = 2 * L * (B * N * FP * FP + B * N * N * FP)
        bytes_accessed = (B * N * N * 4 + B * N * FP * 2      # adj + feat in
                          + L * FP * FP * 2 + L * FP * 4      # W + bias
                          + B * N * FP * 2 + B * L * FP * 4)  # h + g out

        h_bf16, g = pl.pallas_call(
            kernel,
            out_shape=(
                jax.ShapeDtypeStruct((B, N, FP), jnp.bfloat16),
                jax.ShapeDtypeStruct((B, L, FP), jnp.float32),
            ),
            grid_spec=pltpu.PrefetchScalarGridSpec(
                num_scalar_prefetch=0,
                grid=(grid,),
                in_specs=[
                    pl.BlockSpec((tb, N, FP), lambda b: (b, 0, 0)),   # feat (bf16)
                    pl.BlockSpec((tb, N, N), lambda b: (b, 0, 0)),    # adj  (f32)
                    pl.BlockSpec((L, FP, FP), lambda b: (0, 0, 0)),   # W stack
                    pl.BlockSpec((L, 1, FP), lambda b: (0, 0, 0)),    # bias stack
                ],
                out_specs=[
                    pl.BlockSpec((tb, N, FP), lambda b: (b, 0, 0)),   # final h (bf16)
                    pl.BlockSpec((tb, L, FP), lambda b: (b, 0, 0)),   # readouts
                ],
            ),
            compiler_params=pltpu.CompilerParams(
                dimension_semantics=("parallel",),
                vmem_limit_bytes=self.vmem_limit),
            cost_estimate=pl.CostEstimate(
                flops=flops, transcendentals=0, bytes_accessed=bytes_accessed),
        )(feat_in, adj_in, self.w_stack, self.b_stack)

        h = h_bf16[:, :, :self.out_ft].astype(jnp.float32)
        h_1g = (g[:, :, :self.out_ft]).reshape(B, L * self.out_ft)
        return h, h_1g


def _reference(feat, adj, params, num_layers):
    """Pure-JAX f32 reference matching the torch forward."""
    def layer(x, a, w, b, alpha):
        xw = jnp.einsum("bnf,fo->bno", x, w)
        out = jnp.einsum("bnm,bmo->bno", a, xw) + b
        return jnp.where(out > 0, out, alpha * out)

    h = layer(feat, adj, *params[0])
    g = jnp.sum(h, axis=1)
    for idx in range(num_layers - 1):
        h = layer(h, adj, *params[idx + 1])
        g = jnp.concatenate((g, jnp.sum(h, axis=1)), axis=-1)
    return h, g


if __name__ == "__main__":
    key = jax.random.PRNGKey(0)
    B, N, in_ft, out_ft, num_layers = 2, 16, 8, 32, 3

    key, kf, ka, kp = jax.random.split(key, 4)
    feat = jax.random.normal(kf, (B, N, in_ft), jnp.float32)
    # Row-normalized random adjacency (like a normalized graph adjacency).
    raw = jax.random.uniform(ka, (B, N, N), jnp.float32)
    adj = raw / jnp.sum(raw, axis=-1, keepdims=True)

    model = GCNPallas(in_ft, out_ft, num_layers, kp)

    h, h_g = model(feat, adj)
    jax.block_until_ready((h, h_g))

    h_ref, h_g_ref = _reference(feat, adj, model.params, num_layers)
    assert h.shape == (B, N, out_ft)
    assert h_g.shape == (B, out_ft * num_layers)
    # bf16 MXU inputs with f32 accumulation (and bf16 h writeback) -> loosened
    # tolerances vs the f32 reference.
    assert jnp.allclose(h, h_ref, atol=5e-2, rtol=5e-2), \
        float(jnp.max(jnp.abs(h - h_ref)))
    assert jnp.allclose(h_g, h_g_ref, atol=5e-1, rtol=5e-2), \
        float(jnp.max(jnp.abs(h_g - h_g_ref)))

    print("KERNEL_OK")
</pallas_src>

<mosaic_0001>
module attributes {stable_mosaic.version = 11 : i64} {
  func.func @_gcn_fused_kernel(%arg0: i32, %arg1: memref<1x16x128xbf16, #tpu.memory_space<vmem>>, %arg2: memref<1x16x16xf32, #tpu.memory_space<vmem>>, %arg3: memref<3x128x128xbf16, #tpu.memory_space<vmem>>, %arg4: memref<3x1x128xf32, #tpu.memory_space<vmem>>, %arg5: memref<1x16x128xbf16, #tpu.memory_space<vmem>>, %arg6: memref<1x3x128xf32, #tpu.memory_space<vmem>>) attributes {dimension_semantics = [#tpu.dimension_semantics<parallel>], iteration_bounds = array<i64: 2>, scalar_prefetch = 0 : i64, scratch_operands = 0 : i64, tpu.core_type = #tpu.core_type<tc>, window_params = [{transform_indices = @transform_0, window_bounds = array<i64: 1, 16, 128>}, {transform_indices = @transform_1, window_bounds = array<i64: 1, 16, 16>}, {pipeline_mode = #tpu.pipeline_mode<synchronous>, transform_indices = @transform_2, window_bounds = array<i64: 3, 128, 128>}, {pipeline_mode = #tpu.pipeline_mode<synchronous>, transform_indices = @transform_3, window_bounds = array<i64: 3, 1, 128>}, {transform_indices = @transform_4, window_bounds = array<i64: 1, 16, 128>}, {transform_indices = @transform_5, window_bounds = array<i64: 1, 3, 128>}]} {
    %c0 = arith.constant 0 : index
    %c0_0 = arith.constant 0 : index
    %c0_1 = arith.constant 0 : index
    %0 = vector.load %arg1[%c0, %c0_0, %c0_1] : memref<1x16x128xbf16, #tpu.memory_space<vmem>>, vector<1x16x128xbf16>
    %c0_2 = arith.constant 0 : index
    %c0_3 = arith.constant 0 : index
    %c0_4 = arith.constant 0 : index
    %1 = vector.load %arg3[%c0_2, %c0_3, %c0_4] : memref<3x128x128xbf16, #tpu.memory_space<vmem>>, vector<1x128x128xbf16>
    %2 = vector.shape_cast %1 : vector<1x128x128xbf16> to vector<128x128xbf16>
    %c0_5 = arith.constant 0 : index
    %c0_6 = arith.constant 0 : index
    %c0_7 = arith.constant 0 : index
    %3 = vector.load %arg4[%c0_5, %c0_6, %c0_7] : memref<3x1x128xf32, #tpu.memory_space<vmem>>, vector<1x1x128xf32>
    %4 = vector.shape_cast %3 : vector<1x1x128xf32> to vector<1x128xf32>
    %5 = vector.shape_cast %0 : vector<1x16x128xbf16> to vector<16x128xbf16>
    %cst = arith.constant dense<0.000000e+00> : vector<16x128xf32>
    %6 = tpu.matmul %5, %2, %cst {dimension_numbers = #tpu.dot_dimension_numbers<[1], [0], [0], [1], [0, 0, 1, 1], [], []>} : vector<16x128xbf16>, vector<128x128xbf16>, vector<16x128xf32> -> vector<16x128xf32>
    %7 = vector.shape_cast %6 : vector<16x128xf32> to vector<1x16x128xf32>
    %8 = arith.truncf %7 : vector<1x16x128xf32> to vector<1x16x128xbf16>
    %c0_8 = arith.constant 0 : index
    %c0_9 = arith.constant 0 : index
    %c0_10 = arith.constant 0 : index
    %9 = vector.load %arg2[%c0_8, %c0_9, %c0_10] : memref<1x16x16xf32, #tpu.memory_space<vmem>>, vector<1x16x16xf32>
    %10 = arith.truncf %9 : vector<1x16x16xf32> to vector<1x16x16xbf16>
    "tpu.trace_start"() <{level = 10 : i32, message = "bnm,bmo->bno"}> : () -> ()
    %cst_11 = arith.constant dense<0.000000e+00> : vector<1x16x128xf32>
    %11 = tpu.matmul %10, %8, %cst_11 {dimension_numbers = #tpu.dot_dimension_numbers<[2], [1], [1], [2], [0, 0, 0, 1, 1, 2], [0], [0]>} : vector<1x16x16xbf16>, vector<1x16x128xbf16>, vector<1x16x128xf32> -> vector<1x16x128xf32>
    "tpu.trace_stop"() : () -> ()
    %12 = vector.shape_cast %4 : vector<1x128xf32> to vector<1x1x128xf32>
    %13 = vector.broadcast %12 : vector<1x1x128xf32> to vector<1x16x128xf32>
    %14 = arith.addf %11, %13 : vector<1x16x128xf32>
    %cst_12 = arith.constant 0.000000e+00 : f32
    %15 = vector.broadcast %cst_12 : f32 to vector<1x16x128xf32>
    %16 = arith.cmpf ogt, %14, %15 : vector<1x16x128xf32>
    %cst_13 = arith.constant 2.500000e-01 : f32
    %17 = vector.broadcast %cst_13 : f32 to vector<1x16x128xf32>
    %18 = arith.mulf %17, %14 : vector<1x16x128xf32>
    %19 = arith.select %16, %14, %18 : vector<1x16x128xi1>, vector<1x16x128xf32>
    %cst_14 = arith.constant dense<0.000000e+00> : vector<1x128xf32>
    %20 = vector.multi_reduction <add>, %19, %cst_14 [1] : vector<1x16x128xf32> to vector<1x128xf32>
    %21 = vector.shape_cast %20 : vector<1x128xf32> to vector<1x1x128xf32>
    %c0_15 = arith.constant 0 : index
    %c0_16 = arith.constant 0 : index
    %c0_17 = arith.constant 0 : index
    %22 = vector.load %arg6[%c0_15, %c0_16, %c0_17] : memref<1x3x128xf32, #tpu.memory_space<vmem>>, vector<1x1x128xf32>
    tpu.vector_store %arg6[%c0_15, %c0_16, %c0_17], %21 {strides = array<i32>} : memref<1x3x128xf32, #tpu.memory_space<vmem>>, vector<1x1x128xf32>,
    %23 = arith.truncf %19 : vector<1x16x128xf32> to vector<1x16x128xbf16>
    %c1 = arith.constant 1 : index
    %c0_18 = arith.constant 0 : index
    %c0_19 = arith.constant 0 : index
    %24 = vector.load %arg3[%c1, %c0_18, %c0_19] : memref<3x128x128xbf16, #tpu.memory_space<vmem>>, vector<1x128x128xbf16>
    %25 = vector.shape_cast %24 : vector<1x128x128xbf16> to vector<128x128xbf16>
    %c1_20 = arith.constant 1 : index
    %c0_21 = arith.constant 0 : index
    %c0_22 = arith.constant 0 : index
    %26 = vector.load %arg4[%c1_20, %c0_21, %c0_22] : memref<3x1x128xf32, #tpu.memory_space<vmem>>, vector<1x1x128xf32>
    %27 = vector.shape_cast %26 : vector<1x1x128xf32> to vector<1x128xf32>
    %28 = vector.shape_cast %23 : vector<1x16x128xbf16> to vector<16x128xbf16>
    %cst_23 = arith.constant dense<0.000000e+00> : vector<16x128xf32>
    %29 = tpu.matmul %28, %25, %cst_23 {dimension_numbers = #tpu.dot_dimension_numbers<[1], [0], [0], [1], [0, 0, 1, 1], [], []>} : vector<16x128xbf16>, vector<128x128xbf16>, vector<16x128xf32> -> vector<16x128xf32>
    %30 = vector.shape_cast %29 : vector<16x128xf32> to vector<1x16x128xf32>
    %31 = arith.truncf %30 : vector<1x16x128xf32> to vector<1x16x128xbf16>
    %c0_24 = arith.constant 0 : index
    %c0_25 = arith.constant 0 : index
    %c0_26 = arith.constant 0 : index
    %32 = vector.load %arg2[%c0_24, %c0_25, %c0_26] : memref<1x16x16xf32, #tpu.memory_space<vmem>>, vector<1x16x16xf32>
    %33 = arith.truncf %32 : vector<1x16x16xf32> to vector<1x16x16xbf16>
    "tpu.trace_start"() <{level = 10 : i32, message = "bnm,bmo->bno"}> : () -> ()
    %cst_27 = arith.constant dense<0.000000e+00> : vector<1x16x128xf32>
    %34 = tpu.matmul %33, %31, %cst_27 {dimension_numbers = #tpu.dot_dimension_numbers<[2], [1], [1], [2], [0, 0, 0, 1, 1, 2], [0], [0]>} : vector<1x16x16xbf16>, vector<1x16x128xbf16>, vector<1x16x128xf32> -> vector<1x16x128xf32>
    "tpu.trace_stop"() : () -> ()
    %35 = vector.shape_cast %27 : vector<1x128xf32> to vector<1x1x128xf32>
    %36 = vector.broadcast %35 : vector<1x1x128xf32> to vector<1x16x128xf32>
    %37 = arith.addf %34, %36 : vector<1x16x128xf32>
    %cst_28 = arith.constant 0.000000e+00 : f32
    %38 = vector.broadcast %cst_28 : f32 to vector<1x16x128xf32>
    %39 = arith.cmpf ogt, %37, %38 : vector<1x16x128xf32>
    %cst_29 = arith.constant 2.500000e-01 : f32
    %40 = vector.broadcast %cst_29 : f32 to vector<1x16x128xf32>
    %41 = arith.mulf %40, %37 : vector<1x16x128xf32>
    %42 = arith.select %39, %37, %41 : vector<1x16x128xi1>, vector<1x16x128xf32>
    %cst_30 = arith.constant dense<0.000000e+00> : vector<1x128xf32>
    %43 = vector.multi_reduction <add>, %42, %cst_30 [1] : vector<1x16x128xf32> to vector<1x128xf32>
    %44 = vector.shape_cast %43 : vector<1x128xf32> to vector<1x1x128xf32>
    %c0_31 = arith.constant 0 : index
    %c1_32 = arith.constant 1 : index
    %c0_33 = arith.constant 0 : index
    %45 = vector.load %arg6[%c0_31, %c1_32, %c0_33] : memref<1x3x128xf32, #tpu.memory_space<vmem>>, vector<1x1x128xf32>
    tpu.vector_store %arg6[%c0_31, %c1_32, %c0_33], %44 {strides = array<i32>} : memref<1x3x128xf32, #tpu.memory_space<vmem>>, vector<1x1x128xf32>,
    %46 = arith.truncf %42 : vector<1x16x128xf32> to vector<1x16x128xbf16>
    %c2 = arith.constant 2 : index
    %c0_34 = arith.constant 0 : index
    %c0_35 = arith.constant 0 : index
    %47 = vector.load %arg3[%c2, %c0_34, %c0_35] : memref<3x128x128xbf16, #tpu.memory_space<vmem>>, vector<1x128x128xbf16>
    %48 = vector.shape_cast %47 : vector<1x128x128xbf16> to vector<128x128xbf16>
    %c2_36 = arith.constant 2 : index
    %c0_37 = arith.constant 0 : index
    %c0_38 = arith.constant 0 : index
    %49 = vector.load %arg4[%c2_36, %c0_37, %c0_38] : memref<3x1x128xf32, #tpu.memory_space<vmem>>, vector<1x1x128xf32>
    %50 = vector.shape_cast %49 : vector<1x1x128xf32> to vector<1x128xf32>
    %51 = vector.shape_cast %46 : vector<1x16x128xbf16> to vector<16x128xbf16>
    %cst_39 = arith.constant dense<0.000000e+00> : vector<16x128xf32>
    %52 = tpu.matmul %51, %48, %cst_39 {dimension_numbers = #tpu.dot_dimension_numbers<[1], [0], [0], [1], [0, 0, 1, 1], [], []>} : vector<16x128xbf16>, vector<128x128xbf16>, vector<16x128xf32> -> vector<16x128xf32>
    %53 = vector.shape_cast %52 : vector<16x128xf32> to vector<1x16x128xf32>
    %54 = arith.truncf %53 : vector<1x16x128xf32> to vector<1x16x128xbf16>
    %c0_40 = arith.constant 0 : index
    %c0_41 = arith.constant 0 : index
    %c0_42 = arith.constant 0 : index
    %55 = vector.load %arg2[%c0_40, %c0_41, %c0_42] : memref<1x16x16xf32, #tpu.memory_space<vmem>>, vector<1x16x16xf32>
    %56 = arith.truncf %55 : vector<1x16x16xf32> to vector<1x16x16xbf16>
    "tpu.trace_start"() <{level = 10 : i32, message = "bnm,bmo->bno"}> : () -> ()
    %cst_43 = arith.constant dense<0.000000e+00> : vector<1x16x128xf32>
    %57 = tpu.matmul %56, %54, %cst_43 {dimension_numbers = #tpu.dot_dimension_numbers<[2], [1], [1], [2], [0, 0, 0, 1, 1, 2], [0], [0]>} : vector<1x16x16xbf16>, vector<1x16x128xbf16>, vector<1x16x128xf32> -> vector<1x16x128xf32>
    "tpu.trace_stop"() : () -> ()
    %58 = vector.shape_cast %50 : vector<1x128xf32> to vector<1x1x128xf32>
    %59 = vector.broadcast %58 : vector<1x1x128xf32> to vector<1x16x128xf32>
    %60 = arith.addf %57, %59 : vector<1x16x128xf32>
    %cst_44 = arith.constant 0.000000e+00 : f32
    %61 = vector.broadcast %cst_44 : f32 to vector<1x16x128xf32>
    %62 = arith.cmpf ogt, %60, %61 : vector<1x16x128xf32>
    %cst_45 = arith.constant 2.500000e-01 : f32
    %63 = vector.broadcast %cst_45 : f32 to vector<1x16x128xf32>
    %64 = arith.mulf %63, %60 : vector<1x16x128xf32>
    %65 = arith.select %62, %60, %64 : vector<1x16x128xi1>, vector<1x16x128xf32>
    %cst_46 = arith.constant dense<0.000000e+00> : vector<1x128xf32>
    %66 = vector.multi_reduction <add>, %65, %cst_46 [1] : vector<1x16x128xf32> to vector<1x128xf32>
    %67 = vector.shape_cast %66 : vector<1x128xf32> to vector<1x1x128xf32>
    %c0_47 = arith.constant 0 : index
    %c2_48 = arith.constant 2 : index
    %c0_49 = arith.constant 0 : index
    %68 = vector.load %arg6[%c0_47, %c2_48, %c0_49] : memref<1x3x128xf32, #tpu.memory_space<vmem>>, vector<1x1x128xf32>
    tpu.vector_store %arg6[%c0_47, %c2_48, %c0_49], %67 {strides = array<i32>} : memref<1x3x128xf32, #tpu.memory_space<vmem>>, vector<1x1x128xf32>,
    %69 = arith.truncf %65 : vector<1x16x128xf32> to vector<1x16x128xbf16>
    %c0_50 = arith.constant 0 : index
    %c0_51 = arith.constant 0 : index
    %c0_52 = arith.constant 0 : index
    %70 = vector.load %arg5[%c0_50, %c0_51, %c0_52] : memref<1x16x128xbf16, #tpu.memory_space<vmem>>, vector<1x16x128xbf16>
    tpu.vector_store %arg5[%c0_50, %c0_51, %c0_52], %69 {strides = array<i32>} : memref<1x16x128xbf16, #tpu.memory_space<vmem>>, vector<1x16x128xbf16>,
    return
  }
  func.func @transform_0(%arg0: i32) -> (i32, i32, i32) {
    %c0_i32 = arith.constant 0 : i32
    %c0_i32_0 = arith.constant 0 : i32
    %c0_i32_1 = arith.constant 0 : i32
    return %arg0, %c0_i32, %c0_i32_0 : i32, i32, i32
  }
  func.func @transform_1(%arg0: i32) -> (i32, i32, i32) {
    %c0_i32 = arith.constant 0 : i32
    %c0_i32_0 = arith.constant 0 : i32
    %c0_i32_1 = arith.constant 0 : i32
    return %arg0, %c0_i32, %c0_i32_0 : i32, i32, i32
  }
  func.func @transform_2(%arg0: i32) -> (i32, i32, i32) {
    %c0_i32 = arith.constant 0 : i32
    %c0_i32_0 = arith.constant 0 : i32
    %c0_i32_1 = arith.constant 0 : i32
    %c0_i32_2 = arith.constant 0 : i32
    return %c0_i32, %c0_i32_0, %c0_i32_1 : i32, i32, i32
  }
  func.func @transform_3(%arg0: i32) -> (i32, i32, i32) {
    %c0_i32 = arith.constant 0 : i32
    %c0_i32_0 = arith.constant 0 : i32
    %c0_i32_1 = arith.constant 0 : i32
    %c0_i32_2 = arith.constant 0 : i32
    return %c0_i32, %c0_i32_0, %c0_i32_1 : i32, i32, i32
  }
  func.func @transform_4(%arg0: i32) -> (i32, i32, i32) {
    %c0_i32 = arith.constant 0 : i32
    %c0_i32_0 = arith.constant 0 : i32
    %c0_i32_1 = arith.constant 0 : i32
    return %arg0, %c0_i32, %c0_i32_0 : i32, i32, i32
  }
  func.func @transform_5(%arg0: i32) -> (i32, i32, i32) {
    %c0_i32 = arith.constant 0 : i32
    %c0_i32_0 = arith.constant 0 : i32
    %c0_i32_1 = arith.constant 0 : i32
    return %arg0, %c0_i32, %c0_i32_0 : i32, i32, i32
  }
}

</mosaic_0001>

<bundles_post_ra>
// kernel: a_call__.1
= control target key start
LH: loop header
LB: loop body
LE: loop exit
PB: predicated region body
PF: predicated region fallthrough
CT: control target
= control target key end

     0   :  { %11 = vsyncpa [#allocation3], 0  ;;  %s1060_s18 = smov 0   ;;  %s1117_s0 = inlined_call_operand.vmem [shape: bf16[2,16,128], index: 0, kind: input, shape index: {}]   ;;  %s1118_s1 = inlined_call_operand.vmem [shape: f32[2,16,16], index: 1, kind: input, shape index: {}]   ;;  %s1119_s2 = inlined_call_operand.hbm [shape: bf16[3,128,128], index: 2, kind: input, shape index: {}]   ;;  %s1120_s3 = inlined_call_operand.vmem [shape: f32[3,1,128], index: 3, kind: input, shape index: {}]   ;;  %s1121_s4 = inlined_call_operand.vmem [shape: bf16[2,16,128], index: 4, kind: output, shape index: {0}]   ;;  %s1122_s5 = inlined_call_operand.vmem [shape: f32[2,3,128], index: 5, kind: output, shape index: {1}]  }
   0x1 LB: > { %s179_s21 = sshll.u32 %s1119_s2, 4  ;;  %s807_s22 = sadd.s32 4294967295, %s1025_s18   ;;  %s1025_s18 = sphi %s1060_s18, %s17_s18   ;;  %s180_s21 = int_to_ptr.hbm [resolvable:$true] %s179_s21 }
   0x2   : > { %p809_p0 = scmp.ge.s32.totalorder %s1025_s18, 1  ;;  %p168_p1 = scmp.lt.s32.totalorder %s1025_s18, 3 }
   0x3   : > { %p969_p2 = scmp.eq.s32.totalorder %s807_s22, 0  ;;  %s1027_s23 = smov [#allocation2]  }
   0x4   : > { %p169_p3 = pnand %p809_p0, %p168_p1  ;;  %s181_s24 = sshll.u32 %s1027_s23, 4  ;;  %s182_s24 = int_to_ptr.vmem [resolvable:$true] %s181_s24 }
   0x5   : > { %s1028_s25 = smov 64   ;;  %s1029_s26 = smov 4  }
   0x6   : > { %p965_p4 = pneg %p169_p3  ;;  %216 = sbr.rel (%p169_p3) target bundleno = 935 (0x3a7), region = 36 }
   0x8   : > { %p966_p5 = pnand %p969_p2, %p965_p4 }
   0xa   : > { %968 = dma.hbm_to_vmem [thread:$0]  (!%p966_p5), %s180_s21, 3072, %s182_s24, [#allocation3], %s1028_s25, %s1028_s25, %s1029_s26  }
   0xb   : > { %1020 = dma.done.wait (%p969_p2), [#allocation3], 3072  }
   0xc   : > { %1022 = vsyncadd (%p969_p2), [#allocation3], 4294964224  ;;  %v939_v0 = vld [vmem:[#allocation2 + $0x38] sm:$0xff]  ;;  %v938_v1 = vld [vmem:[#allocation2 + $0x30] sm:$0xff]  ;;  %p254_p6 = scmp.lt.s32.totalorder %s807_s22, 1  ;;  %vm381_vm0 = vcmask 130048  }
   0xd   : > { %347 = vmatpush.bf16.msra.mxu0 %v939_v0  ;;  %v937_v2 = vld [vmem:[#allocation2 + $0x28] sm:$0xff]  ;;  %v936_v3 = vld [vmem:[#allocation2 + $0x20] sm:$0xff]  ;;  %v935_v4 = vld [vmem:[#allocation2 + $0x18] sm:$0xff] }
   0xe   : > { %v934_v5 = vld [vmem:[#allocation2 + $0x10] sm:$0xff]  ;;  %s1124_s22 = smov (!%p254_p6, %s807_s22), 1  ;;  %v933_v6 = vld [vmem:[#allocation2 + $0x8] sm:$0xff]  ;;  %v932_v7 = vld [vmem:[#allocation2] sm:$0xff] }
   0xf   : > { %s928_s27 = sshll.u32 %s1124_s22, 3  ;;  %v947_v9 = vld [vmem:[#allocation2 + $0x78] sm:$0xff]  ;;  %v946_v10 = vld [vmem:[#allocation2 + $0x70] sm:$0xff]  ;;  %v945_v11 = vld [vmem:[#allocation2 + $0x68] sm:$0xff]  ;;  %s929_s6 = sshll.u32 %s1124_s22, 4 }
  0x10   : > { %s258_s30 = scalar_lea.vmem %s1117_s0, %s928_s27  ;;  %488 = vmatpush.bf16.msra.mxu2 %v947_v9  ;;  %s263_s9 = scalar_lea.vmem %s1118_s1, %s929_s6  ;;  %v944_v26 = vld [vmem:[#allocation2 + $0x60] sm:$0xff]  ;;  %v943_v27 = vld [vmem:[#allocation2 + $0x58] sm:$0xff]  ;;  %v942_v28 = vld [vmem:[#allocation2 + $0x50] sm:$0xff] }
  0x11   : > { %348 = vmatpush.bf16.msra.mxu0 %v938_v1  ;;  %v931_v8 = vld [vmem:[%s258_s30] sm:$0xff]  ;;  %v364_v14 = vld [vmem:[%s263_s9 + $0x8] sm:$0xff]  ;;  %s820_s12 = sshll.u32 %s1124_s22, 2  ;;  %v955_v52 = vld [vmem:[#allocation2 + $0xb8] sm:$0xff]  ;;  %s268_s24 = scalar_lea.vmem %s1121_s4, %s928_s27 }
  0x12   : > { %v363_v13 = vld [vmem:[%s263_s9] sm:$0xff]  ;;  %v366_v16 = vpack.c.bf16 %v364_v14, %v364_v14  ;;  %v941_v29 = vld [vmem:[#allocation2 + $0x48] sm:$0xff]  ;;  %s1094_s15 = scalar_lea.vmem %s1122_s5, %s820_s12  ;;  %v954_v53 = vld [vmem:[#allocation2 + $0xb0] sm:$0xff] }
  0x13   : > { %v365_v15 = vpack.c.bf16 %v363_v13, %v363_v13  ;;  %v940_v30 = vld [vmem:[#allocation2 + $0x40] sm:$0xff]  ;;  %v953_v54 = vld [vmem:[#allocation2 + $0xa8] sm:$0xff]  ;;  %v951_v63 = vld [vmem:[#allocation2 + $0x98] sm:$0xff] }
  0x14   : > { %489 = vmatpush.bf16.msra.mxu2 %v946_v10  ;;  %v373_v21 = vunpack.c.l.b16 %v366_v16  ;;  %v982_v31 = vld [vmem:[%s1120_s3] ss:$0 sm:$0xff]  ;;  %v950_v0 = vld [vmem:[#allocation2 + $0x90] sm:$0xff]  ;;  %v949_v1 = vld [vmem:[#allocation2 + $0x88] sm:$0xff] }
  0x15   : > { %349 = vmatpush.bf16.msra.mxu0 %v937_v2  ;;  %v372_v20 = vunpack.c.l.b16 %v365_v15  ;;  %v952_v62 = vld [vmem:[#allocation2 + $0xa0] sm:$0xff] }
  0x16   : > { %v948_v2 = vld [vmem:[#allocation2 + $0x80] sm:$0xff] }
  0x17   : > { %v1083_v25 = vpack.c.b16 %v373_v21, %v372_v20 }
  0x18   : > { %490 = vmatpush.bf16.msra.mxu2 %v945_v11 }
  0x19   : > { %350 = vmatpush.bf16.msra.mxu0 %v936_v3  ;;  %v983_v3 = vld [vmem:[%s1120_s3 + $0x1] ss:$0 sm:$0xff] }
  0x1c   : > { %491 = vmatpush.bf16.msra.mxu2 %v944_v26 }
  0x1d   : > { %351 = vmatpush.bf16.msra.mxu0 %v935_v4 }
  0x20   : > { %492 = vmatpush.bf16.msra.mxu2 %v943_v27 }
  0x21   : > { %352 = vmatpush.bf16.msra.mxu0 %v934_v5 }
  0x24   : > { %493 = vmatpush.bf16.msra.mxu2 %v942_v28 }
  0x25   : > { %353 = vmatpush.bf16.msra.mxu0 %v933_v6 }
  0x28   : > { %494 = vmatpush.bf16.msra.mxu2 %v941_v29 }
  0x29   : > { %354 = vmatpush.bf16.msra.mxu0 %v932_v7 }
  0x2c   : > { %355 = vmatmul.bf16.vlgmr.msra.gmra.mxu0 %v931_v8  ;;  %495 = vmatpush.bf16.msra.mxu2 %v940_v30 }
  0xa9   : > { %v356_v12 = vpop.f32.mrf.mxu0 }
  0xaa   : > { %v361_v17 = vpack.c.bf16 %v356_v12, %v356_v12 }
  0xac   : > { %v377_v22 = vunpack.c.l.b16 %v361_v17 }
  0xb1   : > { %v358_v18 = vpop.f32.mrf.mxu0 }
  0xb2   : > { %v362_v19 = vpack.c.bf16 %v358_v18, %v358_v18 }
  0xb4   : > { %v378_v23 = vunpack.c.l.b16 %v362_v19 }
  0xb6   : > { %v379_v24 = vpack.c.b16 %v378_v23, %v377_v22 }
  0xb8   : > { %392 = vmatpush.bf16.msra.mxu1 %v379_v24 }
  0xbb   : > { %857 = vmatmul.msk.bf16.vlgmr.msra.gmra.mxu1 %vm381_vm0, %v1083_v25 }
  0xbc   : > { %628 = vmatpush.bf16.msrb.mxu1 %v955_v52 }
  0xc0   : > { %629 = vmatpush.bf16.msrb.mxu1 %v954_v53 }
  0xc4   : > { %630 = vmatpush.bf16.msrb.mxu1 %v953_v54 }
  0xc8   : > { %631 = vmatpush.bf16.msrb.mxu1 %v952_v62 }
  0xcc   : > { %632 = vmatpush.bf16.msrb.mxu1 %v951_v63 }
  0xd0   : > { %633 = vmatpush.bf16.msrb.mxu1 %v950_v0 }
  0xd4   : > { %634 = vmatpush.bf16.msrb.mxu1 %v949_v1 }
  0xd8   : > { %635 = vmatpush.bf16.msrb.mxu1 %v948_v2 }
 0x138   : > { %v394_v32 = vpop.f32.mrf.mxu1 }
 0x139   : > { %v395_v33 = vadd.f32 %v982_v31, %v394_v32 }
 0x13b   : > { %v401_v34 = vmul.f32 0.25, %v395_v33  ;;  %vm399_vm1 = vcmp.gt.f32.partialorder %v395_v33, 0.0 }
 0x13d   : > { %v403_v37 = vsel %vm399_vm1, %v395_v33, %v401_v34  ;;  %v984_v33 = vld [vmem:[%s1120_s3 + $0x2] ss:$0 sm:$0xff] }
 0x13e   : > { %v413_v39 = vpack.c.bf16 %v403_v37, %v403_v37 }
 0x140   : > { %v396_v35 = vpop.f32.mrf.mxu1  ;;  %v436_v44 = vunpack.c.l.b16 %v413_v39 }
 0x141   : > { %v397_v36 = vadd.f32 %v982_v31, %v396_v35 }
 0x143   : > { %vm400_vm2 = vcmp.gt.f32.partialorder %v397_v36, 0.0  ;;  %v402_v38 = vmul.f32 0.25, %v397_v36 }
 0x145   : > { %v404_v40 = vsel %vm400_vm2, %v397_v36, %v402_v38 }
 0x146   : > { %v405_v41 = vadd.f32 %v404_v40, %v403_v37  ;;  %v414_v42 = vpack.c.bf16 %v404_v40, %v404_v40 }
 0x148   : > { %v406_v43 = vrot.slane %v405_v41, 4  ;;  %v437_v45 = vunpack.c.l.b16 %v414_v42 }
 0x14a   : > { %v407_v46 = vadd.f32 %v406_v43, %v405_v41  ;;  %v438_v47 = vpack.c.b16 %v437_v45, %v436_v44 }
 0x14c   : > { %v408_v48 = vrot.slane %v407_v46, 2  ;;  %496 = vmatmul.bf16.vlgmr.msra.gmra.mxu2 %v438_v47 }
 0x14e   : > { %v409_v49 = vadd.f32 %v408_v48, %v407_v46 }
 0x150   : > { %v410_v50 = vrot.slane %v409_v49, 1 }
 0x152   : > { %v411_v51 = vadd.f32 %v410_v50, %v409_v49 }
 0x154   : > { %412 = vst [vmem:[%s1094_s15] sm:$0x1] %v411_v51 }
 0x1cf   : > { %v497_v55 = vpop.f32.mrf.mxu2 }
 0x1d0   : > { %v502_v56 = vpack.c.bf16 %v497_v55, %v497_v55 }
 0x1d2   : > { %v518_v59 = vunpack.c.l.b16 %v502_v56 }
 0x1d7   : > { %v499_v57 = vpop.f32.mrf.mxu2 }
 0x1d8   : > { %v503_v58 = vpack.c.bf16 %v499_v57, %v499_v57 }
 0x1da   : > { %v519_v60 = vunpack.c.l.b16 %v503_v58 }
 0x1dc   : > { %v520_v61 = vpack.c.b16 %v519_v60, %v518_v59 }
 0x1de   : > { %532 = vmatpush.bf16.msra.mxu3 %v520_v61 }
 0x1e1   : > { %891 = vmatmul.msk.bf16.vlgmr.msra.gmra.mxu3 %vm381_vm0, %v1083_v25 }
 0x264   : > { %v534_v4 = vpop.f32.mrf.mxu3 }
 0x265   : > { %v535_v5 = vadd.f32 %v983_v3, %v534_v4 }
 0x267   : > { %v541_v6 = vmul.f32 0.25, %v535_v5  ;;  %vm539_vm3 = vcmp.gt.f32.partialorder %v535_v5, 0.0 }
 0x269   : > { %v543_v8 = vsel %vm539_vm3, %v535_v5, %v541_v6 }
 0x26a   : > { %v553_v11 = vpack.c.bf16 %v543_v8, %v543_v8 }
 0x26c   : > { %v536_v7 = vpop.f32.mrf.mxu3  ;;  %v576_v16 = vunpack.c.l.b16 %v553_v11 }
 0x26d   : > { %v537_v9 = vadd.f32 %v983_v3, %v536_v7 }
 0x26f   : > { %vm540_vm4 = vcmp.gt.f32.partialorder %v537_v9, 0.0  ;;  %v542_v10 = vmul.f32 0.25, %v537_v9 }
 0x271   : > { %v544_v12 = vsel %vm540_vm4, %v537_v9, %v542_v10 }
 0x272   : > { %v545_v13 = vadd.f32 %v544_v12, %v543_v8  ;;  %v554_v14 = vpack.c.bf16 %v544_v12, %v544_v12 }
 0x274   : > { %v546_v15 = vrot.slane %v545_v13, 4  ;;  %v577_v17 = vunpack.c.l.b16 %v554_v14 }
 0x276   : > { %v547_v18 = vadd.f32 %v546_v15, %v545_v13  ;;  %v578_v19 = vpack.c.b16 %v577_v17, %v576_v16 }
 0x278   : > { %v548_v20 = vrot.slane %v547_v18, 2  ;;  %636 = vmatmul.bf16.vlgmr.msrb.gmra.mxu1 %v578_v19 }
 0x27a   : > { %v549_v21 = vadd.f32 %v548_v20, %v547_v18 }
 0x27c   : > { %v550_v22 = vrot.slane %v549_v21, 1 }
 0x27e   : > { %v551_v23 = vadd.f32 %v550_v22, %v549_v21 }
 0x280   : > { %552 = vst [vmem:[%s1094_s15 + $0x1] sm:$0x1] %v551_v23 }
 0x2f5   : > { %v637_v24 = vpop.f32.mrf.mxu1 }
 0x2f6   : > { %v642_v26 = vpack.c.bf16 %v637_v24, %v637_v24 }
 0x2f8   : > { %v658_v29 = vunpack.c.l.b16 %v642_v26 }
 0x2fd   : > { %v639_v27 = vpop.f32.mrf.mxu1 }
 0x2fe   : > { %v643_v28 = vpack.c.bf16 %v639_v27, %v639_v27 }
 0x300   : > { %v659_v30 = vunpack.c.l.b16 %v643_v28 }
 0x302   : > { %v660_v31 = vpack.c.b16 %v659_v30, %v658_v29 }
 0x304   : > { %672 = vmatpush.bf16.msrb.mxu3 %v660_v31 }
 0x307   : > { %925 = vmatmul.msk.bf16.vlgmr.msrb.gmra.mxu3 %vm381_vm0, %v1083_v25 }
 0x38a   : > { %v674_v32 = vpop.f32.mrf.mxu3 }
 0x38b   : > { %v675_v34 = vadd.f32 %v984_v33, %v674_v32 }
 0x38d   : > { %v681_v36 = vmul.f32 0.25, %v675_v34  ;;  %vm679_vm5 = vcmp.gt.f32.partialorder %v675_v34, 0.0 }
 0x38f   : > { %v683_v39 = vsel %vm679_vm5, %v675_v34, %v681_v36 }
 0x392   : > { %v676_v35 = vpop.f32.mrf.mxu3 }
 0x393   : > { %v677_v37 = vadd.f32 %v984_v33, %v676_v35 }
 0x395   : > { %vm680_vm6 = vcmp.gt.f32.partialorder %v677_v37, 0.0  ;;  %v682_v38 = vmul.f32 0.25, %v677_v37 }
 0x397   : > { %v684_v25 = vsel %vm680_vm6, %v677_v37, %v682_v38 }
 0x398   : > { %v685_v40 = vadd.f32 %v684_v25, %v683_v39  ;;  %v959_v41 = vpack.c.bf16 %v684_v25, %v683_v39 }
 0x39a   : > { %v686_v42 = vrot.slane %v685_v40, 4  ;;  %960 = vst [vmem:[%s268_s24] sm:$0xff] %v959_v41  }
 0x39c   : > { %v687_v43 = vadd.f32 %v686_v42, %v685_v40 }
 0x39e   : > { %v688_v44 = vrot.slane %v687_v43, 2 }
 0x3a0   : > { %v689_v45 = vadd.f32 %v688_v44, %v687_v43 }
 0x3a2   : > { %v690_v46 = vrot.slane %v689_v45, 1 }
 0x3a4   : > { %v691_v47 = vadd.f32 %v690_v46, %v689_v45 }
 0x3a6   : > { %692 = vst [vmem:[%s1094_s15 + $0x2] sm:$0x1] %v691_v47 }
 0x3a7 PF: > { %s17_s18 = sadd.s32 1, %s1025_s18  }
 0x3a8   : > { %p14_p7 = scmp.ge.s32.totalorder %s17_s18, 4  }
 0x3aa   :  { %16 = sbr.rel (!%p14_p7) target bundleno = 1 (0x1), region = 90 }
 0x3af   :  { %732 = vsyncpa [#allocation3], 1 }
 0x3b0   :  { %734 = vsyncpa [#allocation3 + $0x1], 1 }

</bundles_post_ra>
